<compile_context>
chip_gen: v7x
topology: tpu7x:2x2x1
jax: 0.10.0
libtpu: 0.0.40
codegen_flags: <defaults>
</compile_context>

<pallas_src>
import jax
import jax.numpy as jnp
from jax.experimental import pallas as pl
from jax.experimental.pallas import tpu as pltpu


def _round_up(n, m):
    return ((n + m - 1) // m) * m


def _cdiv(a, b):
    return (a + b - 1) // b


def _vmem_capacity_bytes():
    """Per-core VMEM capacity (generation-aware), with a safe fallback."""
    try:
        info = pltpu.get_tpu_info()
        cap = int(getattr(info, "vmem_capacity_bytes", 0))
        if cap > 0:
            return cap
    except Exception:
        pass
    return 128 << 20  # v5e / v6e


def _sublane_multiple(dtype):
    # Sub-32-bit dtypes pack along sublanes; keep row tiles a multiple of the
    # native packed tile (8 f32 / 16 bf16 / 32 int8-fp8) so vld/vst stay unmasked.
    return 8 * max(1, 4 // jnp.dtype(dtype).itemsize)


def _pick_block_rows(Dp, vmem_cap):
    # Target a few MiB of activation traffic per step; keep ~12*tm*Dp*4 B of
    # f32 intermediates well under what is left after the resident weights.
    if Dp <= 256:
        return 1024
    if Dp <= 512:
        return 512
    if Dp <= 1024:
        return 256
    return 128 if vmem_cap <= (96 << 20) else 256


def _make_kernel(D, Dp, mxu_dtype):
    need_pad = Dp != D

    def kernel(x_ref, y_ref, wy_ref, ux_ref, ug_ref, bg_ref, o_ref, *scratch):
        # x_ref / y_ref : (tm, D) row tiles (native dtype)
        # wy_ref        : (Dp, 3*Dp) = [Wr^T | Wz^T | Wg^T]   applied to y
        # ux_ref        : (Dp, 2*Dp) = [Ur^T | Uz^T]          applied to x
        # ug_ref        : (Dp, Dp)   = Ug^T                   applied to r*x
        # bg_ref        : (1, Dp)
        if need_pad:
            xp_ref, yp_ref = scratch
            tm = x_ref.shape[0]
            pad = jnp.zeros((tm, Dp - D), xp_ref.dtype)
            xp_ref[:, D:Dp] = pad          # zero pad lanes (cheap, per step: safe
            yp_ref[:, D:Dp] = pad          # under megacore grid partitioning)
            xp_ref[:, 0:D] = x_ref[...]
            yp_ref[:, 0:D] = y_ref[...]
            x = xp_ref[...]
            y = yp_ref[...]
        else:
            x = x_ref[...]
            y = y_ref[...]

        # Two wide fused MXU matmuls, f32 accumulation.
        yw = jnp.dot(y.astype(mxu_dtype), wy_ref[...],
                     preferred_element_type=jnp.float32)        # (tm, 3Dp)
        xu = jnp.dot(x.astype(mxu_dtype), ux_ref[...],
                     preferred_element_type=jnp.float32)        # (tm, 2Dp)

        # Gating elementwise math stays in f32 (v5e VPU has no bf16).
        x32 = x.astype(jnp.float32)
        r = jax.nn.sigmoid(yw[:, 0:Dp] + xu[:, 0:Dp])
        z = jax.nn.sigmoid(yw[:, Dp:2 * Dp] + xu[:, Dp:2 * Dp]
                           - bg_ref[...].astype(jnp.float32))
        rx = (r * x32).astype(mxu_dtype)                         # back to MXU dtype
        h = jnp.tanh(yw[:, 2 * Dp:3 * Dp]
                     + jnp.dot(rx, ug_ref[...],
                               preferred_element_type=jnp.float32))
        g = x32 + z * (h - x32)            # == (1-z)*x + z*h, one fewer temp
        if need_pad:
            o_ref[...] = g[:, 0:D].astype(o_ref.dtype)
        else:
            o_ref[...] = g.astype(o_ref.dtype)

    return kernel


def prepare_params(params, lane=128, weight_dtype=None):
    """One-time parameter preparation (call once, reuse across forwards).

    Transposes torch-style (out, in) weights to (in, out), zero-pads the
    feature dim to a multiple of `lane`, and concatenates into fused blocks.
    If weight_dtype is None the fused weights keep their native dtype unless
    the f32 copy would not comfortably fit in per-core VMEM (then bf16: halves
    weight VMEM and doubles effective MXU throughput on v6e/v7x).
    """
    D = int(params["bg"].shape[-1])
    Dp = _round_up(D, lane)

    native = jnp.asarray(params["Wr"]).dtype
    if weight_dtype is None:
        vmem_cap = _vmem_capacity_bytes()
        fused_bytes = 6 * Dp * Dp * jnp.dtype(native).itemsize
        weight_dtype = native if fused_bytes <= 0.45 * vmem_cap else jnp.bfloat16

    def prep(w):  # (out, in) -> zero-padded (Dp, Dp), laid out as (in, out)
        wt = jnp.asarray(w).T.astype(weight_dtype)
        return jnp.pad(wt, ((0, Dp - D), (0, Dp - D)))

    w_y = jnp.concatenate(
        [prep(params["Wr"]), prep(params["Wz"]), prep(params["Wg"])], axis=1)
    u_x = jnp.concatenate([prep(params["Ur"]), prep(params["Uz"])], axis=1)
    u_g = prep(params["Ug"])
    bg = jnp.pad(jnp.asarray(params["bg"]).astype(jnp.float32).reshape(1, D),
                 ((0, 0), (0, Dp - D)))
    return {"W_y": w_y, "U_x": u_x, "U_g": u_g, "bg": bg,
            "D": D, "Dp": Dp, "mxu_dtype": jnp.dtype(weight_dtype)}


def gru_gating(x, y, prepared, *, block_rows=None):
    """Pallas implementation of GRUGatingUnit.forward(x, y)."""
    orig_shape = x.shape
    D, Dp = prepared["D"], prepared["Dp"]
    assert orig_shape[-1] == D, "last dim must equal input_dim"
    assert x.shape == y.shape

    xf = x.reshape(-1, D)
    yf = y.reshape(-1, D)
    M = xf.shape[0]

    vmem_cap = _vmem_capacity_bytes()
    sub = _sublane_multiple(x.dtype)
    if block_rows is None:
        block_rows = _pick_block_rows(Dp, vmem_cap)
    tm = min(_round_up(block_rows, sub), _round_up(M, sub))
    # Give both TensorCores work on dual-core chips when the (compute-bound)
    # row range would otherwise collapse to a single grid step.
    if _cdiv(M, tm) == 1 and M >= 256:
        tm = min(tm, _round_up(_cdiv(M, 2), sub))
    grid = _cdiv(M, tm)  # ragged M: overhang rows are garbage, masked on store

    need_pad = Dp != D
    mxu_dtype = prepared["mxu_dtype"]
    a_item = jnp.dtype(x.dtype).itemsize
    w_item = jnp.dtype(prepared["W_y"].dtype).itemsize

    kernel = _make_kernel(D, Dp, mxu_dtype)
    scratch_shapes = ([pltpu.VMEM((tm, Dp), x.dtype)] * 2) if need_pad else []

    # Grid-invariant weights/bias: whole-array, single-buffered VMEM residents.
    vmem_spec = pl.BlockSpec(memory_space=pltpu.MemorySpace.VMEM)
    out_spec = pl.BlockSpec((tm, D), lambda i: (i, 0))

    def run(buffers):
        if buffers > 2:
            row_spec = pl.BlockSpec((tm, D), lambda i: (i, 0),
                                    pipeline_mode=pl.Buffered(buffers))
        else:
            row_spec = pl.BlockSpec((tm, D), lambda i: (i, 0))

        w_bytes = (6 * Dp * Dp + Dp) * w_item        # resident fused weights + bias
        act_bytes = buffers * 3 * tm * D * a_item    # pipelined x, y, out tiles
        pad_bytes = (2 * tm * Dp * a_item) if need_pad else 0
        f32_tmp = 12 * tm * Dp * 4                   # yw/xu/r/z/h/g/x32 headroom
        vmem_limit = int(1.2 * (w_bytes + act_bytes + pad_bytes + f32_tmp)) + (4 << 20)
        vmem_limit = min(max(vmem_limit, 16 << 20), int(0.9 * vmem_cap))

        cost = pl.CostEstimate(
            flops=12 * M * Dp * Dp,
            transcendentals=3 * M * Dp,
            bytes_accessed=3 * M * D * a_item + w_bytes,
        )

        return pl.pallas_call(
            kernel,
            out_shape=jax.ShapeDtypeStruct((M, D), x.dtype),
            grid_spec=pltpu.PrefetchScalarGridSpec(
                num_scalar_prefetch=0,
                grid=(grid,),
                in_specs=[row_spec, row_spec,
                          vmem_spec, vmem_spec, vmem_spec, vmem_spec],
                out_specs=out_spec,
                scratch_shapes=scratch_shapes,
            ),
            compiler_params=pltpu.CompilerParams(
                dimension_semantics=("parallel",),
                vmem_limit_bytes=vmem_limit,
            ),
            cost_estimate=cost,
        )(xf, yf, prepared["W_y"], prepared["U_x"], prepared["U_g"], prepared["bg"])

    # 3-deep input pipelining helps when Dp is small (DMA-latency bound);
    # fall back to default double buffering if this jax build rejects it.
    if Dp <= 512:
        try:
            out = run(3)
        except Exception:
            out = run(2)
    else:
        out = run(2)

    return out.reshape(orig_shape)


def _reference(x, y, params):
    """Pure-JAX reference matching the PyTorch module semantics."""
    def lin(w, a):  # torch Linear, no bias: a @ w.T
        return a @ w.T
    p = params
    r = jax.nn.sigmoid(lin(p["Wr"], y) + lin(p["Ur"], x))
    z = jax.nn.sigmoid(lin(p["Wz"], y) + lin(p["Uz"], x) - p["bg"])
    h = jnp.tanh(lin(p["Wg"], y) + lin(p["Ug"], r * x))
    return (1.0 - z) * x + z * h


def init_params(key, input_dim, bg=2.0, dtype=jnp.float32):
    # Deterministic synthetic init (shapes match nn.Linear(input_dim, input_dim)).
    names = ["Wr", "Ur", "Wz", "Uz", "Wg", "Ug"]
    keys = jax.random.split(key, len(names))
    bound = 1.0 / jnp.sqrt(input_dim)
    params = {
        n: jax.random.uniform(k, (input_dim, input_dim), dtype,
                              minval=-bound, maxval=bound)
        for n, k in zip(names, keys)
    }
    params["bg"] = jnp.full((input_dim,), bg, dtype=dtype)
    return params


if __name__ == "__main__":
    batch, seq, hidden = 2, 8, 32
    key = jax.random.PRNGKey(0)
    kx, ky, kp = jax.random.split(key, 3)

    x = jax.random.normal(kx, (batch, seq, hidden), jnp.float32)
    y = jax.random.normal(ky, (batch, seq, hidden), jnp.float32)
    params = init_params(kp, hidden, bg=2.0)

    prepared = prepare_params(params)          # one-time weight prep
    out = gru_gating(x, y, prepared)
    out = jax.block_until_ready(out)

    ref = _reference(x, y, params)
    assert out.shape == x.shape
    assert jnp.allclose(out, ref, atol=1e-5, rtol=1e-5), "mismatch vs reference"

    print("KERNEL_OK")
</pallas_src>

<mosaic_0001>
module attributes {stable_mosaic.version = 11 : i64} {
  func.func @kernel(%arg0: i32, %arg1: memref<16x32xf32, #tpu.memory_space<vmem>>, %arg2: memref<16x32xf32, #tpu.memory_space<vmem>>, %arg3: memref<128x384xf32, #tpu.memory_space<vmem>>, %arg4: memref<128x256xf32, #tpu.memory_space<vmem>>, %arg5: memref<128x128xf32, #tpu.memory_space<vmem>>, %arg6: memref<1x128xf32, #tpu.memory_space<vmem>>, %arg7: memref<16x32xf32, #tpu.memory_space<vmem>>, %arg8: memref<16x128xf32, #tpu.memory_space<vmem>>, %arg9: memref<16x128xf32, #tpu.memory_space<vmem>>) attributes {dimension_semantics = [#tpu.dimension_semantics<parallel>], iteration_bounds = array<i64: 1>, scalar_prefetch = 0 : i64, scratch_operands = 2 : i64, tpu.core_type = #tpu.core_type<tc>, window_params = [{transform_indices = @transform_0, window_bounds = array<i64: 16, 32>}, {transform_indices = @transform_1, window_bounds = array<i64: 16, 32>}, {pipeline_mode = #tpu.pipeline_mode<synchronous>, transform_indices = @transform_2, window_bounds = array<i64: 128, 384>}, {pipeline_mode = #tpu.pipeline_mode<synchronous>, transform_indices = @transform_3, window_bounds = array<i64: 128, 256>}, {pipeline_mode = #tpu.pipeline_mode<synchronous>, transform_indices = @transform_4, window_bounds = array<i64: 128, 128>}, {pipeline_mode = #tpu.pipeline_mode<synchronous>, transform_indices = @transform_5, window_bounds = array<i64: 1, 128>}, {transform_indices = @transform_6, window_bounds = array<i64: 16, 32>}]} {
    %cst = arith.constant 0.000000e+00 : f32
    %0 = vector.broadcast %cst : f32 to vector<16x96xf32>
    %c0 = arith.constant 0 : index
    %c32 = arith.constant 32 : index
    %1 = vector.load %arg8[%c0, %c32] : memref<16x128xf32, #tpu.memory_space<vmem>>, vector<16x96xf32>
    tpu.vector_store %arg8[%c0, %c32], %0 {strides = array<i32>} : memref<16x128xf32, #tpu.memory_space<vmem>>, vector<16x96xf32>,
    %c0_0 = arith.constant 0 : index
    %c32_1 = arith.constant 32 : index
    %2 = vector.load %arg9[%c0_0, %c32_1] : memref<16x128xf32, #tpu.memory_space<vmem>>, vector<16x96xf32>
    tpu.vector_store %arg9[%c0_0, %c32_1], %0 {strides = array<i32>} : memref<16x128xf32, #tpu.memory_space<vmem>>, vector<16x96xf32>,
    %c0_2 = arith.constant 0 : index
    %c0_3 = arith.constant 0 : index
    %3 = vector.load %arg1[%c0_2, %c0_3] : memref<16x32xf32, #tpu.memory_space<vmem>>, vector<16x32xf32>
    %c0_4 = arith.constant 0 : index
    %c0_5 = arith.constant 0 : index
    %4 = vector.load %arg8[%c0_4, %c0_5] : memref<16x128xf32, #tpu.memory_space<vmem>>, vector<16x32xf32>
    tpu.vector_store %arg8[%c0_4, %c0_5], %3 {strides = array<i32>} : memref<16x128xf32, #tpu.memory_space<vmem>>, vector<16x32xf32>,
    %c0_6 = arith.constant 0 : index
    %c0_7 = arith.constant 0 : index
    %5 = vector.load %arg2[%c0_6, %c0_7] : memref<16x32xf32, #tpu.memory_space<vmem>>, vector<16x32xf32>
    %c0_8 = arith.constant 0 : index
    %c0_9 = arith.constant 0 : index
    %6 = vector.load %arg9[%c0_8, %c0_9] : memref<16x128xf32, #tpu.memory_space<vmem>>, vector<16x32xf32>
    tpu.vector_store %arg9[%c0_8, %c0_9], %5 {strides = array<i32>} : memref<16x128xf32, #tpu.memory_space<vmem>>, vector<16x32xf32>,
    %c0_10 = arith.constant 0 : index
    %c0_11 = arith.constant 0 : index
    %7 = vector.load %arg8[%c0_10, %c0_11] : memref<16x128xf32, #tpu.memory_space<vmem>>, vector<16x128xf32>
    %c0_12 = arith.constant 0 : index
    %c0_13 = arith.constant 0 : index
    %8 = vector.load %arg9[%c0_12, %c0_13] : memref<16x128xf32, #tpu.memory_space<vmem>>, vector<16x128xf32>
    %c0_14 = arith.constant 0 : index
    %c0_15 = arith.constant 0 : index
    %9 = vector.load %arg3[%c0_14, %c0_15] : memref<128x384xf32, #tpu.memory_space<vmem>>, vector<128x384xf32>
    %cst_16 = arith.constant dense<0.000000e+00> : vector<16x384xf32>
    %10 = tpu.matmul %8, %9, %cst_16 {dimension_numbers = #tpu.dot_dimension_numbers<[1], [0], [0], [1], [0, 0, 1, 1], [], []>} : vector<16x128xf32>, vector<128x384xf32>, vector<16x384xf32> -> vector<16x384xf32>
    %c0_17 = arith.constant 0 : index
    %c0_18 = arith.constant 0 : index
    %11 = vector.load %arg4[%c0_17, %c0_18] : memref<128x256xf32, #tpu.memory_space<vmem>>, vector<128x256xf32>
    %cst_19 = arith.constant dense<0.000000e+00> : vector<16x256xf32>
    %12 = tpu.matmul %7, %11, %cst_19 {dimension_numbers = #tpu.dot_dimension_numbers<[1], [0], [0], [1], [0, 0, 1, 1], [], []>} : vector<16x128xf32>, vector<128x256xf32>, vector<16x256xf32> -> vector<16x256xf32>
    %13 = vector.extract_strided_slice %10 {offsets = [0, 0], sizes = [16, 128], strides = [1, 1]} : vector<16x384xf32> to vector<16x128xf32>
    %14 = vector.extract_strided_slice %12 {offsets = [0, 0], sizes = [16, 128], strides = [1, 1]} : vector<16x256xf32> to vector<16x128xf32>
    %15 = arith.addf %13, %14 : vector<16x128xf32>
    %16 = arith.negf %15 : vector<16x128xf32>
    %17 = math.exp %16 : vector<16x128xf32>
    %cst_20 = arith.constant 1.000000e+00 : f32
    %18 = vector.broadcast %cst_20 : f32 to vector<16x128xf32>
    %19 = arith.addf %18, %17 : vector<16x128xf32>
    %20 = arith.divf %18, %19 : vector<16x128xf32>
    %21 = vector.extract_strided_slice %10 {offsets = [0, 128], sizes = [16, 128], strides = [1, 1]} : vector<16x384xf32> to vector<16x128xf32>
    %22 = vector.extract_strided_slice %12 {offsets = [0, 128], sizes = [16, 128], strides = [1, 1]} : vector<16x256xf32> to vector<16x128xf32>
    %23 = arith.addf %21, %22 : vector<16x128xf32>
    %c0_21 = arith.constant 0 : index
    %c0_22 = arith.constant 0 : index
    %24 = vector.load %arg6[%c0_21, %c0_22] : memref<1x128xf32, #tpu.memory_space<vmem>>, vector<1x128xf32>
    %25 = vector.broadcast %24 : vector<1x128xf32> to vector<16x128xf32>
    %26 = arith.subf %23, %25 : vector<16x128xf32>
    %27 = arith.negf %26 : vector<16x128xf32>
    %28 = math.exp %27 : vector<16x128xf32>
    %cst_23 = arith.constant 1.000000e+00 : f32
    %29 = vector.broadcast %cst_23 : f32 to vector<16x128xf32>
    %30 = arith.addf %29, %28 : vector<16x128xf32>
    %31 = arith.divf %29, %30 : vector<16x128xf32>
    %32 = arith.mulf %20, %7 : vector<16x128xf32>
    %33 = vector.extract_strided_slice %10 {offsets = [0, 256], sizes = [16, 128], strides = [1, 1]} : vector<16x384xf32> to vector<16x128xf32>
    %c0_24 = arith.constant 0 : index
    %c0_25 = arith.constant 0 : index
    %34 = vector.load %arg5[%c0_24, %c0_25] : memref<128x128xf32, #tpu.memory_space<vmem>>, vector<128x128xf32>
    %cst_26 = arith.constant dense<0.000000e+00> : vector<16x128xf32>
    %35 = tpu.matmul %32, %34, %cst_26 {dimension_numbers = #tpu.dot_dimension_numbers<[1], [0], [0], [1], [0, 0, 1, 1], [], []>} : vector<16x128xf32>, vector<128x128xf32>, vector<16x128xf32> -> vector<16x128xf32>
    %36 = arith.addf %33, %35 : vector<16x128xf32>
    %37 = math.tanh %36 : vector<16x128xf32>
    %38 = arith.subf %37, %7 : vector<16x128xf32>
    %39 = arith.mulf %31, %38 : vector<16x128xf32>
    %40 = arith.addf %7, %39 : vector<16x128xf32>
    %41 = vector.extract_strided_slice %40 {offsets = [0, 0], sizes = [16, 32], strides = [1, 1]} : vector<16x128xf32> to vector<16x32xf32>
    %c0_27 = arith.constant 0 : index
    %c0_28 = arith.constant 0 : index
    %42 = vector.load %arg7[%c0_27, %c0_28] : memref<16x32xf32, #tpu.memory_space<vmem>>, vector<16x32xf32>
    tpu.vector_store %arg7[%c0_27, %c0_28], %41 {strides = array<i32>} : memref<16x32xf32, #tpu.memory_space<vmem>>, vector<16x32xf32>,
    return
  }
  func.func @transform_0(%arg0: i32) -> (i32, i32) {
    %c0_i32 = arith.constant 0 : i32
    %c0_i32_0 = arith.constant 0 : i32
    return %arg0, %c0_i32 : i32, i32
  }
  func.func @transform_1(%arg0: i32) -> (i32, i32) {
    %c0_i32 = arith.constant 0 : i32
    %c0_i32_0 = arith.constant 0 : i32
    return %arg0, %c0_i32 : i32, i32
  }
  func.func @transform_2(%arg0: i32) -> (i32, i32) {
    %c0_i32 = arith.constant 0 : i32
    %c0_i32_0 = arith.constant 0 : i32
    %c0_i32_1 = arith.constant 0 : i32
    return %c0_i32, %c0_i32_0 : i32, i32
  }
  func.func @transform_3(%arg0: i32) -> (i32, i32) {
    %c0_i32 = arith.constant 0 : i32
    %c0_i32_0 = arith.constant 0 : i32
    %c0_i32_1 = arith.constant 0 : i32
    return %c0_i32, %c0_i32_0 : i32, i32
  }
  func.func @transform_4(%arg0: i32) -> (i32, i32) {
    %c0_i32 = arith.constant 0 : i32
    %c0_i32_0 = arith.constant 0 : i32
    %c0_i32_1 = arith.constant 0 : i32
    return %c0_i32, %c0_i32_0 : i32, i32
  }
  func.func @transform_5(%arg0: i32) -> (i32, i32) {
    %c0_i32 = arith.constant 0 : i32
    %c0_i32_0 = arith.constant 0 : i32
    %c0_i32_1 = arith.constant 0 : i32
    return %c0_i32, %c0_i32_0 : i32, i32
  }
  func.func @transform_6(%arg0: i32) -> (i32, i32) {
    %c0_i32 = arith.constant 0 : i32
    %c0_i32_0 = arith.constant 0 : i32
    return %arg0, %c0_i32 : i32, i32
  }
}

</mosaic_0001>

<bundles_post_ra>
// kernel: tpu_custom_call.1
= control target key start
LH: loop header
LB: loop body
LE: loop exit
PB: predicated region body
PF: predicated region fallthrough
CT: control target
= control target key end

     0   :  { %11 = vsyncpa [#allocation5], 0  ;;  %s1177_s0 = inlined_call_operand.hbm [shape: f32[16,32], index: 0, kind: input, shape index: {}]   ;;  %s1178_s1 = inlined_call_operand.hbm [shape: f32[16,32], index: 1, kind: input, shape index: {}]   ;;  %s1179_s2 = inlined_call_operand.hbm [shape: f32[128,384], index: 2, kind: input, shape index: {}]   ;;  %s1180_s3 = inlined_call_operand.hbm [shape: f32[128,256], index: 3, kind: input, shape index: {}]   ;;  %s1181_s4 = inlined_call_operand.hbm [shape: f32[128,128], index: 4, kind: input, shape index: {}]   ;;  %s1182_s5 = inlined_call_operand.vmem [shape: f32[1,128], index: 5, kind: input, shape index: {}]   ;;  %s1183_s6 = inlined_call_operand.hbm [shape: f32[16,32], index: 6, kind: output, shape index: {}]  }
   0x1   :  { %12 = vsyncpa [#allocation8], 0 }
   0x2   :  { %13 = vsyncpa [#allocation11], 0 }
   0x3   :  { %14 = vsyncpa [#allocation6], 0  ;;  %s998_s21 = smov [#allocation7]   ;;  %s999_s23 = smov [#allocation10]  }
   0x4   :  { %s32_s22 = sshll.u32 %s998_s21, 4  ;;  %s56_s24 = sshll.u32 %s999_s23, 4  ;;  %s33_s22 = int_to_ptr.vmem [resolvable:$true] %s32_s22  ;;  %s1046_s24 = int_to_ptr.vmem [resolvable:$true] %s56_s24 }
   0x5   :  { %s858_s27 = scalar_lea.hbm %s1178_s1, 256 }
   0x6   :  { %p859_p0 = scmp.ne.s32.totalorder %s1178_s1, %s858_s27  ;;  %p862_p1 = scmp.lt.u32.totalorder %s858_s27, %s1178_s1 }
   0x8   :  { %p864_p2 = pnand %p862_p1, %p859_p0 }
   0xa   :  { %867 = shalt.err (!%p864_p2)
}
   0xb   :  { %s868_s8 = scalar_lea.vmem %s33_s22, 256  ;;  %p873_p4 = scmp.lt.s32.totalorder %s33_s22, %s33_s22 }
   0xc   :  { %p869_p3 = scmp.ne.s32.totalorder %s33_s22, %s868_s8  ;;  %p874_p5 = scmp.lt.s32.totalorder %s868_s8, %s868_s8 }
   0xe   :  { %p875_p6 = por %p874_p5, %p873_p4 }
  0x10   :  { %p876_p7 = pnand %p875_p6, %p869_p3 }
  0x12   :  { %879 = shalt.err (!%p876_p7)
}
  0x13   :  { %s1000_s9 = smov 128   ;;  %s1001_s10 = smov 8  }
  0x14   :  { %38 = dma.hbm_to_vmem [thread:$0]  %s1178_s1, 256, %s33_s22, [#allocation8], %s1000_s9, %s1000_s9, %s1001_s10  }
  0x15   :  { %s880_s15 = scalar_lea.hbm %s1180_s3, 4096 }
  0x16   :  { %p881_p8 = scmp.ne.s32.totalorder %s1180_s3, %s880_s15  ;;  %p884_p9 = scmp.lt.u32.totalorder %s880_s15, %s1180_s3 }
  0x18   :  { %p886_p10 = pnand %p884_p9, %p881_p8 }
  0x1a   :  { %889 = shalt.err (!%p886_p10)
}
  0x1b   :  { %s890_s20 = scalar_lea.vmem %s1046_s24, 4096  ;;  %p895_p12 = scmp.lt.s32.totalorder %s1046_s24, %s1046_s24 }
  0x1c   :  { %p891_p11 = scmp.ne.s32.totalorder %s1046_s24, %s890_s20  ;;  %p896_p13 = scmp.lt.s32.totalorder %s890_s20, %s890_s20 }
  0x1e   :  { %p897_p0 = por %p896_p13, %p895_p12 }
  0x20   :  { %p898_p1 = pnand %p897_p0, %p891_p11 }
  0x22   :  { %901 = shalt.err (!%p898_p1)
}
  0x23   :  { %s1002_s1 = smov 256   ;;  %s1003_s21 = smov 16  }
  0x24   :  { %62 = dma.hbm_to_vmem [thread:$0]  %s1180_s3, 4096, %s1046_s24, [#allocation11], %s1002_s1, %s1002_s1, %s1003_s21  }
  0x25   :  { %s1004_s25 = smov [#allocation4]   ;;  %s1005_s27 = smov [#allocation9]  }
  0x26   :  { %s20_s26 = sshll.u32 %s1004_s25, 4  ;;  %s44_s28 = sshll.u32 %s1005_s27, 4  ;;  %s21_s26 = int_to_ptr.vmem [resolvable:$true] %s20_s26  ;;  %s1080_s28 = int_to_ptr.vmem [resolvable:$true] %s44_s28 }
  0x27   :  { %s902_s7 = scalar_lea.hbm %s1177_s0, 256 }
  0x28   :  { %p903_p2 = scmp.ne.s32.totalorder %s1177_s0, %s902_s7  ;;  %p906_p3 = scmp.lt.u32.totalorder %s902_s7, %s1177_s0 }
  0x2a   :  { %p908_p4 = pnand %p906_p3, %p903_p2 }
  0x2c   :  { %911 = shalt.err (!%p908_p4)
}
  0x2d   :  { %s912_s3 = scalar_lea.vmem %s21_s26, 256  ;;  %p917_p6 = scmp.lt.s32.totalorder %s21_s26, %s21_s26 }
  0x2e   :  { %p913_p5 = scmp.ne.s32.totalorder %s21_s26, %s912_s3  ;;  %p918_p7 = scmp.lt.s32.totalorder %s912_s3, %s912_s3 }
  0x30   :  { %p919_p8 = por %p918_p7, %p917_p6 }
  0x32   :  { %p920_p9 = pnand %p919_p8, %p913_p5 }
  0x34   :  { %923 = shalt.err (!%p920_p9)
}
  0x35   :  { %26 = dma.hbm_to_vmem [thread:$0]  %s1177_s0, 256, %s21_s26, [#allocation5], %s1000_s9, %s1000_s9, %s1001_s10  }
  0x36   :  { %s924_s17 = scalar_lea.hbm %s1179_s2, 6144 }
  0x37   :  { %p925_p10 = scmp.ne.s32.totalorder %s1179_s2, %s924_s17  ;;  %p928_p11 = scmp.lt.u32.totalorder %s924_s17, %s1179_s2 }
  0x39   :  { %p930_p12 = pnand %p928_p11, %p925_p10 }
  0x3b   :  { %933 = shalt.err (!%p930_p12)
}
  0x3c   :  { %s934_s21 = scalar_lea.vmem %s1080_s28, 6144  ;;  %p939_p0 = scmp.lt.s32.totalorder %s1080_s28, %s1080_s28 }
  0x3d   :  { %p935_p13 = scmp.ne.s32.totalorder %s1080_s28, %s934_s21  ;;  %p940_p1 = scmp.lt.s32.totalorder %s934_s21, %s934_s21 }
  0x3f   :  { %p941_p2 = por %p940_p1, %p939_p0 }
  0x41   :  { %p942_p3 = pnand %p941_p2, %p935_p13 }
  0x43   :  { %945 = shalt.err (!%p942_p3)
}
  0x44   :  { %s1006_s0 = smov 384   ;;  %s1007_s22 = smov 24  }
  0x45   :  { %50 = dma.hbm_to_vmem [thread:$0]  %s1179_s2, 6144, %s1080_s28, [#allocation8], %s1006_s0, %s1006_s0, %s1007_s22  }
  0x46   :  { %s1008_s26 = smov [#allocation12]   ;;  %s946_s7 = scalar_lea.hbm %s1181_s4, 2048 }
  0x47   :  { %s68_s27 = sshll.u32 %s1008_s26, 4  ;;  %p947_p4 = scmp.ne.s32.totalorder %s1181_s4, %s946_s7  ;;  %s69_s27 = int_to_ptr.vmem [resolvable:$true] %s68_s27 }
  0x48   :  { %p950_p5 = scmp.lt.u32.totalorder %s946_s7, %s1181_s4 }
  0x4a   :  { %p952_p6 = pnand %p950_p5, %p947_p4 }
  0x4c   :  { %955 = shalt.err (!%p952_p6)
}
  0x4d   :  { %s956_s3 = scalar_lea.vmem %s69_s27, 2048  ;;  %p961_p8 = scmp.lt.s32.totalorder %s69_s27, %s69_s27 }
  0x4e   :  { %p957_p7 = scmp.ne.s32.totalorder %s69_s27, %s956_s3  ;;  %p962_p9 = scmp.lt.s32.totalorder %s956_s3, %s956_s3 }
  0x50   :  { %p963_p10 = por %p962_p9, %p961_p8 }
  0x52   :  { %p964_p11 = pnand %p963_p10, %p957_p7 }
  0x54   :  { %967 = shalt.err (!%p964_p11)
}
  0x55   :  { %74 = dma.hbm_to_vmem [thread:$0]  %s1181_s4, 2048, %s69_s27, [#allocation11], %s1000_s9, %s1000_s9, %s1001_s10  }
  0x56   :  { %990 = dma.done.wait [#allocation5], 256  }
  0x57   :  { %991 = vsyncadd [#allocation5], 4294967040 }
  0x58   :  { %992 = dma.done.wait [#allocation8], 6400  }
  0x59   :  { %993 = vsyncadd [#allocation8], 4294960896 }
  0x5a   :  { %994 = dma.done.wait [#allocation11], 6144  }
  0x5b   :  { %995 = vsyncadd [#allocation11], 4294961152  ;;  %vm92_vm0 = vcmask 1047808   ;;  %v1009_v0 = vmov 0.0   ;;  %v111_v1 = vld [vmem:[#allocation9 + $0x8] sm:$0xff]  ;;  %v114_v2 = vld [vmem:[#allocation9 + $0x20] sm:$0xff] }
  0x5c   :  { %93 = vst.msk [vmem:[#allocation2] sm:$0xff] %vm92_vm0, %v1009_v0  ;;  %94 = vst.msk [vmem:[#allocation2 + $0x8] sm:$0xff] %vm92_vm0, %v1009_v0  ;;  %222 = vmatprep.mubr.f32.mxu0 %v1009_v0  ;;  %v110_v3 = vld [vmem:[#allocation9] sm:$0xff]  ;;  %v691_v4 = vpack.c.bf16 %v114_v2, %v111_v1  ;;  %v113_v5 = vld [vmem:[#allocation9 + $0x18] sm:$0xff]  ;;  %vm99_vm1 = vcmask 261120  }
  0x5d   :  { %95 = vst.msk [vmem:[#allocation3] sm:$0xff] %vm92_vm0, %v1009_v0  ;;  %96 = vst.msk [vmem:[#allocation3 + $0x8] sm:$0xff] %vm92_vm0, %v1009_v0  ;;  %v117_v6 = vld [vmem:[#allocation9 + $0x38] sm:$0xff]  ;;  %v120_v7 = vld [vmem:[#allocation9 + $0x50] sm:$0xff]  ;;  %v693_v8 = vpack.c.bf16 %v113_v5, %v110_v3 }
  0x5e   :  { %v695_v9 = vpack.c.bf16 %v120_v7, %v117_v6  ;;  %v116_v10 = vld [vmem:[#allocation9 + $0x30] sm:$0xff]  ;;  %v119_v11 = vld [vmem:[#allocation9 + $0x48] sm:$0xff]  ;;  %692 = vmatprep.subr.bf16.mxu0 %v691_v4  ;;  %v126_v13 = vld [vmem:[#allocation9 + $0x80] sm:$0xff] }
  0x5f   :  { %v123_v12 = vld [vmem:[#allocation9 + $0x68] sm:$0xff]  ;;  %694 = vmatpush1.bf16.msra.mxu0 %v693_v8  ;;  %v697_v14 = vpack.c.bf16 %v119_v11, %v116_v10  ;;  %v122_v16 = vld [vmem:[#allocation9 + $0x60] sm:$0xff]  ;;  %v125_v17 = vld [vmem:[#allocation9 + $0x78] sm:$0xff] }
  0x60   :  { %696 = vmatprep.subr.bf16.mxu0 %v695_v9  ;;  %v699_v15 = vpack.c.bf16 %v126_v13, %v123_v12  ;;  %v129_v18 = vld [vmem:[#allocation9 + $0x98] sm:$0xff]  ;;  %v132_v19 = vld [vmem:[#allocation9 + $0xb0] sm:$0xff]  ;;  %v701_v20 = vpack.c.bf16 %v125_v17, %v122_v16  ;;  %v131_v23 = vld [vmem:[#allocation9 + $0xa8] sm:$0xff] }
  0x61   :  { %v703_v21 = vpack.c.bf16 %v132_v19, %v129_v18  ;;  %v128_v22 = vld [vmem:[#allocation9 + $0x90] sm:$0xff]  ;;  %v135_v24 = vld [vmem:[#allocation9 + $0xc8] sm:$0xff]  ;;  %v138_v25 = vld [vmem:[#allocation9 + $0xe0] sm:$0xff] }
  0x62   :  { %v97_v26 = vld [vmem:[#allocation4] sm:$0xff]  ;;  %v102_v27 = vld [vmem:[#allocation7] sm:$0xff]  ;;  %v705_v28 = vpack.c.bf16 %v131_v23, %v128_v22  ;;  %v707_v29 = vpack.c.bf16 %v138_v25, %v135_v24  ;;  %v137_v31 = vld [vmem:[#allocation9 + $0xd8] sm:$0xff] }
  0x63   :  { %698 = vmatpush1.bf16.msra.mxu0 %v697_v14  ;;  %100 = vst.msk [vmem:[#allocation2] sm:$0xff] %vm99_vm1, %v97_v26  ;;  %104 = vst.msk [vmem:[#allocation3] sm:$0xff] %vm99_vm1, %v102_v27  ;;  %v134_v30 = vld [vmem:[#allocation9 + $0xc0] sm:$0xff]  ;;  %v141_v32 = vld [vmem:[#allocation9 + $0xf8] sm:$0xff] }
  0x64   :  { %700 = vmatprep.subr.bf16.mxu0 %v699_v15  ;;  %v144_v33 = vld [vmem:[#allocation9 + $0x110] sm:$0xff]  ;;  %v709_v34 = vpack.c.bf16 %v137_v31, %v134_v30  ;;  %v143_v37 = vld [vmem:[#allocation9 + $0x108] sm:$0xff]  ;;  %v150_v39 = vld [vmem:[#allocation9 + $0x140] sm:$0xff] }
  0x65   :  { %v711_v35 = vpack.c.bf16 %v144_v33, %v141_v32  ;;  %v140_v36 = vld [vmem:[#allocation9 + $0xf0] sm:$0xff]  ;;  %v147_v38 = vld [vmem:[#allocation9 + $0x128] sm:$0xff]  ;;  %v146_v43 = vld [vmem:[#allocation9 + $0x120] sm:$0xff] }
  0x66   :  { %v713_v41 = vpack.c.bf16 %v143_v37, %v140_v36  ;;  %v715_v42 = vpack.c.bf16 %v150_v39, %v147_v38  ;;  %v149_v44 = vld [vmem:[#allocation9 + $0x138] sm:$0xff]  ;;  %v156_v47 = vld [vmem:[#allocation9 + $0x170] sm:$0xff]  ;;  %v98_v48 = vld [vmem:[#allocation4 + $0x8] sm:$0xff] }
  0x67   :  { %702 = vmatpush1.bf16.msra.mxu0 %v701_v20  ;;  %v103_v45 = vld [vmem:[#allocation7 + $0x8] sm:$0xff]  ;;  %v112_v49 = vld [vmem:[#allocation9 + $0x10] sm:$0xff]  ;;  %v115_v50 = vld [vmem:[#allocation9 + $0x28] sm:$0xff]  ;;  %v717_v51 = vpack.c.bf16 %v149_v44, %v146_v43  ;;  %101 = vst.msk [vmem:[#allocation2 + $0x8] sm:$0xff] %vm99_vm1, %v98_v48 }
  0x68   :  { %704 = vmatprep.subr.bf16.mxu0 %v703_v21  ;;  %v153_v46 = vld [vmem:[#allocation9 + $0x158] sm:$0xff]  ;;  %105 = vst.msk [vmem:[#allocation3 + $0x8] sm:$0xff] %vm99_vm1, %v103_v45  ;;  %v152_v52 = vld [vmem:[#allocation9 + $0x150] sm:$0xff]  ;;  %v723_v53 = vpack.c.bf16 %v115_v50, %v112_v49  ;;  %v118_v54 = vld [vmem:[#allocation9 + $0x40] sm:$0xff] }
  0x69   :  { %v121_v55 = vld [vmem:[#allocation9 + $0x58] sm:$0xff]  ;;  %v719_v56 = vpack.c.bf16 %v156_v47, %v153_v46  ;;  %v155_v57 = vld [vmem:[#allocation9 + $0x168] sm:$0xff]  ;;  %v124_v59 = vld [vmem:[#allocation9 + $0x70] sm:$0xff] }
  0x6a   :  { %v108_v40 = vld [vmem:[#allocation3] sm:$0xff]  ;;  %v727_v58 = vpack.c.bf16 %v121_v55, %v118_v54  ;;  %v127_v60 = vld [vmem:[#allocation9 + $0x88] sm:$0xff]  ;;  %v313_v62 = vld [vmem:[#allocation10 + $0x18] sm:$0xff]  ;;  %724 = vmatprep.subr.bf16.mxu1 %v723_v53  ;;  %v721_v63 = vpack.c.bf16 %v155_v57, %v152_v52 }
  0x6b   :  { %706 = vmatpush1.bf16.msra.mxu0 %v705_v28  ;;  %653 = vmatprep.mubr.f32.mxu1 %v108_v40  ;;  %v311_v61 = vld [vmem:[#allocation10 + $0x8] sm:$0xff]  ;;  %v731_v1 = vpack.c.bf16 %v127_v60, %v124_v59  ;;  %v310_v3 = vld [vmem:[#allocation10] sm:$0xff]  ;;  %v312_v4 = vld [vmem:[#allocation10 + $0x10] sm:$0xff] }
  0x6c   :  { %708 = vmatprep.subr.bf16.mxu0 %v707_v29  ;;  %726 = vmatpush3.bf16.msra.mxu1 %v723_v53  ;;  %v755_v2 = vpack.c.bf16 %v313_v62, %v311_v61  ;;  %v315_v5 = vld [vmem:[#allocation10 + $0x28] sm:$0xff]  ;;  %v317_v6 = vld [vmem:[#allocation10 + $0x38] sm:$0xff]  ;;  %v130_v7 = vld [vmem:[#allocation9 + $0xa0] sm:$0xff]  ;;  %v757_v9 = vpack.c.bf16 %v312_v4, %v310_v3 }
  0x6d   :  { %728 = vmatprep.subr.bf16.mxu1 %v727_v58  ;;  %v133_v8 = vld [vmem:[#allocation9 + $0xb8] sm:$0xff]  ;;  %v759_v10 = vpack.c.bf16 %v317_v6, %v315_v5  ;;  %v314_v11 = vld [vmem:[#allocation10 + $0x20] sm:$0xff]  ;;  %v316_v12 = vld [vmem:[#allocation10 + $0x30] sm:$0xff] }
  0x6e   :  { %v319_v13 = vld [vmem:[#allocation10 + $0x48] sm:$0xff]  ;;  %v735_v14 = vpack.c.bf16 %v133_v8, %v130_v7  ;;  %v321_v15 = vld [vmem:[#allocation10 + $0x58] sm:$0xff]  ;;  %v136_v16 = vld [vmem:[#allocation9 + $0xd0] sm:$0xff]  ;;  %v761_v18 = vpack.c.bf16 %v316_v12, %v314_v11 }
  0x6f   :  { %710 = vmatpush1.bf16.msra.mxu0 %v709_v34  ;;  %v139_v17 = vld [vmem:[#allocation9 + $0xe8] sm:$0xff]  ;;  %v318_v19 = vld [vmem:[#allocation10 + $0x40] sm:$0xff]  ;;  %v1139_v20 = vld [vmem:[#allocation3 + $0x8] sm:$0xff]  ;;  %v763_v21 = vpack.c.bf16 %v321_v15, %v319_v13 }
  0x70   :  { %712 = vmatprep.subr.bf16.mxu0 %v711_v35  ;;  %730 = vmatpush3.bf16.msra.mxu1 %v727_v58  ;;  %v320_v22 = vld [vmem:[#allocation10 + $0x50] sm:$0xff]  ;;  %v739_v23 = vpack.c.bf16 %v139_v17, %v136_v16  ;;  %v142_v24 = vld [vmem:[#allocation9 + $0x100] sm:$0xff]  ;;  %v145_v25 = vld [vmem:[#allocation9 + $0x118] sm:$0xff] }
  0x71   :  { %732 = vmatprep.subr.bf16.mxu1 %v731_v1  ;;  %v323_v26 = vld [vmem:[#allocation10 + $0x68] sm:$0xff]  ;;  %v325_v27 = vld [vmem:[#allocation10 + $0x78] sm:$0xff]  ;;  %v765_v28 = vpack.c.bf16 %v320_v22, %v318_v19  ;;  %v322_v29 = vld [vmem:[#allocation10 + $0x60] sm:$0xff]  ;;  %v743_v30 = vpack.c.bf16 %v145_v25, %v142_v24 }
  0x72   :  { %v767_v31 = vpack.c.bf16 %v325_v27, %v323_v26  ;;  %v324_v32 = vld [vmem:[#allocation10 + $0x70] sm:$0xff]  ;;  %v151_v34 = vld [vmem:[#allocation9 + $0x148] sm:$0xff]  ;;  %v329_v36 = vld [vmem:[#allocation10 + $0x98] sm:$0xff] }
  0x73   :  { %714 = vmatpush1.bf16.msra.mxu0 %v713_v41  ;;  %v148_v33 = vld [vmem:[#allocation9 + $0x130] sm:$0xff]  ;;  %v327_v35 = vld [vmem:[#allocation10 + $0x88] sm:$0xff]  ;;  %v769_v37 = vpack.c.bf16 %v324_v32, %v322_v29  ;;  %v326_v38 = vld [vmem:[#allocation10 + $0x80] sm:$0xff] }
  0x74   :  { %716 = vmatprep.subr.bf16.mxu0 %v715_v42  ;;  %734 = vmatpush3.bf16.msra.mxu1 %v731_v1  ;;  %v747_v39 = vpack.c.bf16 %v151_v34, %v148_v33  ;;  %v328_v41 = vld [vmem:[#allocation10 + $0x90] sm:$0xff]  ;;  %v154_v42 = vld [vmem:[#allocation9 + $0x160] sm:$0xff]  ;;  %v157_v43 = vld [vmem:[#allocation9 + $0x178] sm:$0xff] }
  0x75   :  { %736 = vmatprep.subr.bf16.mxu1 %v735_v14  ;;  %v331_v44 = vld [vmem:[#allocation10 + $0xa8] sm:$0xff]  ;;  %v333_v45 = vld [vmem:[#allocation10 + $0xb8] sm:$0xff]  ;;  %v773_v46 = vpack.c.bf16 %v328_v41, %v326_v38  ;;  %v751_v47 = vpack.c.bf16 %v157_v43, %v154_v42  ;;  %v330_v49 = vld [vmem:[#allocation10 + $0xa0] sm:$0xff] }
  0x76   :  { %v775_v48 = vpack.c.bf16 %v333_v45, %v331_v44  ;;  %v332_v50 = vld [vmem:[#allocation10 + $0xb0] sm:$0xff]  ;;  %v337_v52 = vld [vmem:[#allocation10 + $0xd8] sm:$0xff]  ;;  %v334_v55 = vld [vmem:[#allocation10 + $0xc0] sm:$0xff] }
  0x77   :  { %718 = vmatpush1.bf16.msra.mxu0 %v717_v51  ;;  %v335_v51 = vld [vmem:[#allocation10 + $0xc8] sm:$0xff]  ;;  %v777_v53 = vpack.c.bf16 %v332_v50, %v330_v49  ;;  %v341_v58 = vld [vmem:[#allocation10 + $0xf8] sm:$0xff]  ;;  %v338_v61 = vld [vmem:[#allocation10 + $0xe0] sm:$0xff] }
  0x78   :  { %720 = vmatprep.subr.bf16.mxu0 %v719_v56  ;;  %738 = vmatpush3.bf16.msra.mxu1 %v735_v14  ;;  %v779_v54 = vpack.c.bf16 %v337_v52, %v335_v51  ;;  %v336_v56 = vld [vmem:[#allocation10 + $0xd0] sm:$0xff]  ;;  %v339_v57 = vld [vmem:[#allocation10 + $0xe8] sm:$0xff]  ;;  %v1144_v1 = vld [vmem:[#allocation2] sm:$0xff] }
  0x79   :  { %740 = vmatprep.subr.bf16.mxu1 %v739_v23  ;;  %v781_v59 = vpack.c.bf16 %v336_v56, %v334_v55  ;;  %v783_v60 = vpack.c.bf16 %v341_v58, %v339_v57  ;;  %v340_v62 = vld [vmem:[#allocation10 + $0xf0] sm:$0xff]  ;;  %v458_v3 = vld [vmem:[#allocation12] sm:$0xff]  ;;  %v459_v4 = vld [vmem:[#allocation12 + $0x8] sm:$0xff] }
  0x7a   :  { %v787_v5 = vpack.c.bf16 %v459_v4, %v458_v3  ;;  %v460_v6 = vld [vmem:[#allocation12 + $0x10] sm:$0xff]  ;;  %v461_v7 = vld [vmem:[#allocation12 + $0x18] sm:$0xff]  ;;  %v466_v14 = vld [vmem:[#allocation12 + $0x40] sm:$0xff] }
  0x7b   :  { %722 = vmatpush1.bf16.msra.mxu0 %v721_v63  ;;  %v785_v63 = vpack.c.bf16 %v340_v62, %v338_v61  ;;  %v791_v8 = vpack.c.bf16 %v461_v7, %v460_v6  ;;  %v465_v12 = vld [vmem:[#allocation12 + $0x38] sm:$0xff]  ;;  %v467_v15 = vld [vmem:[#allocation12 + $0x48] sm:$0xff]  ;;  %v468_v17 = vld [vmem:[#allocation12 + $0x50] sm:$0xff] }
  0x7c   :  { %756 = vmatprep.subr.bf16.mxu0 %v755_v2  ;;  %742 = vmatpush3.bf16.msra.mxu1 %v739_v23  ;;  %v1148_v2 = vld [vmem:[#allocation2 + $0x8] sm:$0xff]  ;;  %v803_v16 = vpack.c.bf16 %v467_v15, %v466_v14  ;;  %v472_v23 = vld [vmem:[#allocation12 + $0x70] sm:$0xff]  ;;  %v473_v24 = vld [vmem:[#allocation12 + $0x78] sm:$0xff] }
  0x7d   :  { %744 = vmatprep.subr.bf16.mxu1 %v743_v30  ;;  %v815_v25 = vpack.c.bf16 %v473_v24, %v472_v23 }
  0x7e   :  { %223 = vmatmul.mubr.f32.vlgmr.msra.gmra.mrb[0].mxu0 %v108_v40  ;;  %v771_v40 = vpack.c.bf16 %v329_v36, %v327_v35 }
  0x7f   :  { %758 = vmatpush1.bf16.msra.mxu0 %v757_v9  ;;  %228 = vmatprep.mubr.f32.mxu0 %v1009_v0  ;;  %v462_v9 = vld [vmem:[#allocation12 + $0x20] sm:$0xff] }
  0x80   :  { %760 = vmatprep.subr.bf16.mxu0 %v759_v10  ;;  %746 = vmatpush3.bf16.msra.mxu1 %v743_v30  ;;  %v463_v10 = vld [vmem:[#allocation12 + $0x28] sm:$0xff] }
  0x81   :  { %748 = vmatprep.subr.bf16.mxu1 %v747_v39  ;;  %v795_v11 = vpack.c.bf16 %v463_v10, %v462_v9 }
  0x82   :  { %229 = vmatmul.mubr.f32.gmra.mrb[2].mxu0 %v1139_v20 }
  0x83   :  { %762 = vmatpush1.bf16.msra.mxu0 %v761_v18  ;;  %406 = vmatprep.mubr.f32.mxu0 %v1009_v0  ;;  %v469_v18 = vld [vmem:[#allocation12 + $0x58] sm:$0xff] }
  0x84   :  { %764 = vmatprep.subr.bf16.mxu0 %v763_v21  ;;  %750 = vmatpush3.bf16.msra.mxu1 %v747_v39  ;;  %v807_v19 = vpack.c.bf16 %v469_v18, %v468_v17  ;;  %v471_v21 = vld [vmem:[#allocation12 + $0x68] sm:$0xff] }
  0x85   :  { %752 = vmatprep.subr.bf16.mxu1 %v751_v47 }
  0x87   :  { %766 = vmatpush1.bf16.msra.mxu0 %v765_v28 }
  0x88   :  { %768 = vmatprep.subr.bf16.mxu0 %v767_v31  ;;  %754 = vmatpush3.bf16.msra.mxu1 %v751_v47 }
  0x89   :  { %788 = vmatprep.subr.bf16.mxu1 %v787_v5 }
  0x8b   :  { %770 = vmatpush1.bf16.msra.mxu0 %v769_v37  ;;  %654 = vmatmul.mubr.f32.vlgmr.msra.gmra.mrb[0].mxu1 %v1139_v20  ;;  %v470_v20 = vld [vmem:[#allocation12 + $0x60] sm:$0xff] }
  0x8c   :  { %772 = vmatprep.subr.bf16.mxu0 %v771_v40  ;;  %790 = vmatpush3.bf16.msra.mxu1 %v787_v5  ;;  %v811_v22 = vpack.c.bf16 %v471_v21, %v470_v20  ;;  %v582_v40 = vld [vmem:[%s1182_s5] ss:$0 sm:$0xff]  ;;  %s1010_s5 = smov [#allocation13]  }
  0x8d   :  { %792 = vmatprep.subr.bf16.mxu1 %v791_v8  ;;  %s566_s14 = sshll.u32 %s1010_s5, 4  ;;  %s567_s14 = int_to_ptr.vmem [resolvable:$true] %s566_s14 }
  0x8e   :  { %s968_s15 = scalar_lea.vmem %s567_s14, 256  ;;  %p973_p13 = scmp.lt.s32.totalorder %s567_s14, %s567_s14 }
  0x8f   :  { %774 = vmatpush1.bf16.msra.mxu0 %v773_v46  ;;  %p969_p12 = scmp.ne.s32.totalorder %s567_s14, %s968_s15  ;;  %p974_p0 = scmp.lt.s32.totalorder %s968_s15, %s968_s15 }
  0x90   :  { %776 = vmatprep.subr.bf16.mxu0 %v775_v48  ;;  %794 = vmatpush3.bf16.msra.mxu1 %v791_v8 }
  0x91   :  { %796 = vmatprep.subr.bf16.mxu1 %v795_v11  ;;  %p975_p1 = por %p974_p0, %p973_p13 }
  0x93   :  { %778 = vmatpush1.bf16.msra.mxu0 %v777_v53  ;;  %p976_p2 = pnand %p975_p1, %p969_p12 }
  0x94   :  { %780 = vmatprep.subr.bf16.mxu0 %v779_v54  ;;  %798 = vmatpush3.bf16.msra.mxu1 %v795_v11 }
  0x97   :  { %782 = vmatpush1.bf16.msra.mxu0 %v781_v59 }
  0x98   :  { %784 = vmatprep.subr.bf16.mxu0 %v783_v60 }
  0x9b   :  { %786 = vmatpush1.bf16.msra.mxu0 %v785_v63 }
  0x9e   :  { %407 = vmatmul.mubr.f32.vlgmr.msra.gmra.mrb[0].mxu0 %v1144_v1 }
  0x9f   :  { %412 = vmatprep.mubr.f32.mxu0 %v1009_v0  ;;  %v464_v0 = vld [vmem:[#allocation12 + $0x30] sm:$0xff] }
  0xa0   :  { %v799_v13 = vpack.c.bf16 %v465_v12, %v464_v0 }
  0xa2   :  { %413 = vmatmul.mubr.f32.gmra.mrb[2].mxu0 %v1148_v2  ;;  %800 = vmatprep.subr.bf16.mxu1 %v799_v13 }
  0xa3   :  { %802 = vmatpush3.bf16.msra.mxu1 %v799_v13 }
  0xa4   :  { %804 = vmatprep.subr.bf16.mxu1 %v803_v16 }
  0xa7   :  { %806 = vmatpush3.bf16.msra.mxu1 %v803_v16 }
  0xa8   :  { %808 = vmatprep.subr.bf16.mxu1 %v807_v19 }
  0xab   :  { %810 = vmatpush3.bf16.msra.mxu1 %v807_v19 }
  0xac   :  { %812 = vmatprep.subr.bf16.mxu1 %v811_v22 }
  0xaf   :  { %814 = vmatpush3.bf16.msra.mxu1 %v811_v22 }
  0xb0   :  { %816 = vmatprep.subr.bf16.mxu1 %v815_v25 }
  0xb3   :  { %818 = vmatpush3.bf16.msra.mxu1 %v815_v25 }
 0x171   :  { %v408_v26 = vpop.f32.mrb[0].mxu0 }
 0x172   :  { %v580_v27 = vmul.f32 -1.442695, %v408_v26  ;;  %v410_v28 = vpop.f32.mrb[1].mxu0 }
 0x173   :  { %v442_v42 = vsub.f32 %v410_v28, %v582_v40 }
 0x174   :  { %838 = vpow2.f32 %v580_v27 }
 0x175   :  { %v414_v29 = vpop.f32.mrb[2].mxu0  ;;  %v583_v44 = vmul.f32 -1.442695, %v442_v42 }
 0x176   :  { %v581_v30 = vmul.f32 -1.442695, %v414_v29  ;;  %v416_v31 = vpop.f32.mrb[3].mxu0 }
 0x177   :  { %v443_v41 = vsub.f32 %v416_v31, %v582_v40 }
 0x178   :  { %840 = vpow2.f32 %v581_v30 }
 0x179   :  { %v584_v43 = vmul.f32 -1.442695, %v443_v41 }
 0x17e   :  { %v839_v32 = vpop.eup %838 }
 0x17f   :  { %v427_v33 = vadd.f32 1.0, %v839_v32 }
 0x181   :  { %842 = vrcp.f32 %v427_v33 }
 0x182   :  { %v841_v34 = vpop.eup %840 }
 0x183   :  { %v428_v35 = vadd.f32 1.0, %v841_v34 }
 0x185   :  { %844 = vrcp.f32 %v428_v35 }
 0x186   :  { %846 = vpow2.f32 %v584_v43 }
 0x187   :  { %848 = vpow2.f32 %v583_v44 }
 0x18b   :  { %v843_v36 = vpop.eup %842 }
 0x18c   :  { %v456_v37 = vmul.f32 %v843_v36, %v1144_v1 }
 0x18e   :  { %688 = vmatprep.mubr.f32.mxu1 %v456_v37 }
 0x18f   :  { %v845_v38 = vpop.eup %844 }
 0x190   :  { %v457_v39 = vmul.f32 %v845_v38, %v1148_v2  ;;  %v847_v45 = vpop.eup %846 }
 0x191   :  { %v849_v46 = vpop.eup %848  ;;  %v451_v47 = vadd.f32 1.0, %v847_v45 }
 0x192   :  { %689 = vmatmul.mubr.f32.vlgmr.msra.gmra.mrb[0].mxu1 %v457_v39  ;;  %v450_v48 = vadd.f32 1.0, %v849_v46 }
 0x265   :  { %v690_v49 = vpop.f32.mrb[0].mxu1 }
 0x266   :  { %850 = vtanh.f32 %v690_v49  ;;  %v540_v50 = vpop.f32.mrb[1].mxu1 }
 0x267   :  { %852 = vtanh.f32 %v540_v50 }
 0x268   :  { %854 = vrcp.f32 %v451_v47 }
 0x269   :  { %856 = vrcp.f32 %v450_v48 }
 0x270   :  { %v851_v51 = vpop.eup %850 }
 0x271   :  { %v853_v52 = vpop.eup %852  ;;  %v554_v53 = vsub.f32 %v851_v51, %v1148_v2 }
 0x272   :  { %v855_v54 = vpop.eup %854  ;;  %v553_v55 = vsub.f32 %v853_v52, %v1144_v1 }
 0x273   :  { %v857_v56 = vpop.eup %856  ;;  %v556_v57 = vmul.f32 %v855_v54, %v554_v53 }
 0x274   :  { %v555_v58 = vmul.f32 %v857_v56, %v553_v55 }
 0x275   :  { %v558_v59 = vadd.f32 %v556_v57, %v1148_v2 }
 0x276   :  { %v557_v60 = vadd.f32 %v555_v58, %v1144_v1 }
 0x277   :  { %560 = vst.msk [vmem:[#allocation13 + $0x8] sm:$0xff] %vm99_vm1, %v558_v59 }
 0x278   :  { %559 = vst.msk [vmem:[#allocation13] sm:$0xff] %vm99_vm1, %v557_v60 }
 0x279   :  { %979 = shalt.err (!%p976_p2)
}
 0x27a   :  { %s980_s18 = scalar_lea.hbm %s1183_s6, 256 }
 0x27b   :  { %p981_p3 = scmp.ne.s32.totalorder %s1183_s6, %s980_s18  ;;  %p984_p4 = scmp.lt.u32.totalorder %s980_s18, %s1183_s6 }
 0x27d   :  { %p986_p5 = pnand %p984_p4, %p981_p3 }
 0x27f   :  { %989 = shalt.err (!%p986_p5)
}
 0x280   :  { %572 = dma.vmem_to_hbm [thread:$0]  %s567_s14, 256, %s1183_s6, [#allocation6], %s1000_s9, %s1000_s9, %s1001_s10  }
 0x281   :  { %996 = dma.done.wait [#allocation6], 256  }
 0x282   :  { %997 = vsyncadd [#allocation6], 4294967040 }
 0x283   :  { %576 = vsyncpa [#allocation5], 1 }
 0x284   :  { %577 = vsyncpa [#allocation8], 1 }
 0x285   :  { %578 = vsyncpa [#allocation11], 1 }
 0x286   :  { %579 = vsyncpa [#allocation6], 1 }

</bundles_post_ra>
